<compile_context>
chip_gen: v7x
topology: tpu7x:2x2x1
jax: 0.10.0
libtpu: 0.0.40
codegen_flags: <defaults>
</compile_context>

<pallas_src>
import jax
import jax.numpy as jnp
from jax.experimental import pallas as pl
from jax.experimental.pallas import tpu as pltpu


def _round_up(n, m):
    return ((n + m - 1) // m) * m


def _pad2d(a, rows, cols, dtype):
    """Cast to dtype and zero-pad a 2-D array to (rows, cols) (no-op copy-free
    path when already the right shape/dtype)."""
    a = a.astype(dtype)
    if a.shape == (rows, cols):
        return a
    return jnp.zeros((rows, cols), dtype).at[: a.shape[0], : a.shape[1]].set(a)


def _geu_kernel(x_ref, w1_ref, b1_ref, w2_ref, b2_ref, o_ref):
    # x_ref : (TB, D_in_p)       bf16
    # w1_ref: (D_in_p, D_out_p)  bf16     b1_ref: (1, D_out_p) f32
    # w2_ref: (D_out_p, D_out_p) bf16     b2_ref: (1, D_out_p) f32
    # o_ref : (TB, D_out_p)      out dtype
    h = jnp.dot(x_ref[...], w1_ref[...],
                preferred_element_type=jnp.float32) + b1_ref[...]
    g = jnp.dot(h.astype(w2_ref.dtype), w2_ref[...],
                preferred_element_type=jnp.float32) + b2_ref[...]
    o_ref[...] = (h * jax.nn.sigmoid(g)).astype(o_ref.dtype)


def gated_embedding_unit(x, w1_t, b1, w2_t, b2, *, block_b=256):
    """x: (B, D_in); w1_t: (D_in, D_out); b1: (D_out,);
       w2_t: (D_out, D_out); b2: (D_out,).  Returns (B, D_out) in x.dtype."""
    B, D_in = x.shape
    D_out = w1_t.shape[1]
    out_dtype = x.dtype
    out_bytes = jnp.dtype(out_dtype).itemsize

    # Lane-dense feature padding (multiples of 128), 16-aligned batch tile.
    d_in_p = _round_up(D_in, 128)
    d_out_p = _round_up(D_out, 128)
    tb = _round_up(max(16, min(block_b, _round_up(B, 16))), 16)
    b_p = _round_up(B, tb)

    # MXU operands in bf16; biases stay f32 for the f32 epilogue.
    x_p = _pad2d(x, b_p, d_in_p, jnp.bfloat16)
    w1_p = _pad2d(w1_t, d_in_p, d_out_p, jnp.bfloat16)
    w2_p = _pad2d(w2_t, d_out_p, d_out_p, jnp.bfloat16)
    b1_p = _pad2d(b1.reshape(1, -1), 1, d_out_p, jnp.float32)
    b2_p = _pad2d(b2.reshape(1, -1), 1, d_out_p, jnp.float32)

    grid = (pl.cdiv(b_p, tb),)

    # VMEM budget: resident (double-buffered) weights/biases + pipelined x/out
    # tiles + f32 elementwise temps, with 1.5x headroom.
    vmem_est = (
        2 * 2 * (d_in_p * d_out_p + d_out_p * d_out_p)   # bf16 weights, 2 bufs
        + 2 * 4 * 2 * d_out_p                            # f32 biases, 2 bufs
        + 2 * 2 * tb * d_in_p                            # bf16 x tile, 2 bufs
        + 2 * out_bytes * tb * d_out_p                   # out tile, 2 bufs
        + 4 * 4 * tb * d_out_p                           # f32 temps (h, g, ...)
    )
    vmem_limit = int(min(max(vmem_est * 3 // 2, 32 << 20), 100 << 20))

    cost = pl.CostEstimate(
        flops=2 * b_p * d_in_p * d_out_p + 2 * b_p * d_out_p * d_out_p,
        transcendentals=b_p * d_out_p,  # one exp per sigmoid output
        bytes_accessed=(x_p.size * 2 + w1_p.size * 2 + w2_p.size * 2
                        + b1_p.size * 4 + b2_p.size * 4
                        + b_p * d_out_p * out_bytes),
    )

    out_p = pl.pallas_call(
        _geu_kernel,
        out_shape=jax.ShapeDtypeStruct((b_p, d_out_p), out_dtype),
        grid_spec=pltpu.PrefetchScalarGridSpec(
            num_scalar_prefetch=0,
            grid=grid,
            in_specs=[
                pl.BlockSpec((tb, d_in_p), lambda i: (i, 0)),        # x: per-tile
                pl.BlockSpec((d_in_p, d_out_p), lambda i: (0, 0)),   # W1: resident
                pl.BlockSpec((1, d_out_p), lambda i: (0, 0)),        # b1: resident
                pl.BlockSpec((d_out_p, d_out_p), lambda i: (0, 0)),  # W2: resident
                pl.BlockSpec((1, d_out_p), lambda i: (0, 0)),        # b2: resident
            ],
            out_specs=pl.BlockSpec((tb, d_out_p), lambda i: (i, 0)),
        ),
        compiler_params=pltpu.CompilerParams(
            dimension_semantics=("parallel",),   # megacore-shardable on v7x
            vmem_limit_bytes=vmem_limit,
        ),
        cost_estimate=cost,
    )(x_p, w1_p, b1_p, w2_p, b2_p)

    if (b_p, d_out_p) == (B, D_out):
        return out_p
    return out_p[:B, :D_out]


def _reference(x, w1_t, b1, w2_t, b2):
    # Matches kernel precision: bf16 matmul operands, f32 accumulation/epilogue.
    h = jnp.dot(x.astype(jnp.bfloat16), w1_t.astype(jnp.bfloat16),
                preferred_element_type=jnp.float32) + b1
    g = jnp.dot(h.astype(jnp.bfloat16), w2_t.astype(jnp.bfloat16),
                preferred_element_type=jnp.float32) + b2
    return h * jax.nn.sigmoid(g)


if __name__ == "__main__":
    # GatedEmbeddingUnit(input_dimension=32, output_dimension=64), batch 32.
    B, D_in, D_out = 32, 32, 64

    key = jax.random.PRNGKey(0)
    kx, kw1, kb1, kw2, kb2 = jax.random.split(key, 5)

    x = jax.random.normal(kx, (B, D_in), dtype=jnp.float32)
    # nn.Linear(in, out): weight (out, in), bias (out,). Weights are passed
    # pre-transposed as (D_in, D_out) / (D_out, D_out) for row-major matmuls.
    w1_t = jax.random.normal(kw1, (D_in, D_out), dtype=jnp.float32) * 0.1
    b1 = jax.random.normal(kb1, (D_out,), dtype=jnp.float32) * 0.1
    w2_t = jax.random.normal(kw2, (D_out, D_out), dtype=jnp.float32) * 0.1
    b2 = jax.random.normal(kb2, (D_out,), dtype=jnp.float32) * 0.1

    # block_b=16 -> batch grid of 2 tiles, exercising the pipelined path.
    out = gated_embedding_unit(x, w1_t, b1, w2_t, b2, block_b=16)
    out = jax.block_until_ready(out)

    ref = _reference(x, w1_t, b1, w2_t, b2)
    assert out.shape == (B, D_out)
    assert jnp.allclose(out, ref, atol=2e-3, rtol=2e-3), (
        float(jnp.max(jnp.abs(out - ref))))

    print("KERNEL_OK")
</pallas_src>

<mosaic_0001>
module attributes {stable_mosaic.version = 11 : i64} {
  func.func @_geu_kernel(%arg0: i32, %arg1: memref<16x128xbf16, #tpu.memory_space<vmem>>, %arg2: memref<128x128xbf16, #tpu.memory_space<vmem>>, %arg3: memref<1x128xf32, #tpu.memory_space<vmem>>, %arg4: memref<128x128xbf16, #tpu.memory_space<vmem>>, %arg5: memref<1x128xf32, #tpu.memory_space<vmem>>, %arg6: memref<16x128xf32, #tpu.memory_space<vmem>>) attributes {dimension_semantics = [#tpu.dimension_semantics<parallel>], iteration_bounds = array<i64: 2>, scalar_prefetch = 0 : i64, scratch_operands = 0 : i64, tpu.core_type = #tpu.core_type<tc>, window_params = [{transform_indices = @transform_0, window_bounds = array<i64: 16, 128>}, {pipeline_mode = #tpu.pipeline_mode<synchronous>, transform_indices = @transform_1, window_bounds = array<i64: 128, 128>}, {pipeline_mode = #tpu.pipeline_mode<synchronous>, transform_indices = @transform_2, window_bounds = array<i64: 1, 128>}, {pipeline_mode = #tpu.pipeline_mode<synchronous>, transform_indices = @transform_3, window_bounds = array<i64: 128, 128>}, {pipeline_mode = #tpu.pipeline_mode<synchronous>, transform_indices = @transform_4, window_bounds = array<i64: 1, 128>}, {transform_indices = @transform_5, window_bounds = array<i64: 16, 128>}]} {
    %c0 = arith.constant 0 : index
    %c0_0 = arith.constant 0 : index
    %0 = vector.load %arg1[%c0, %c0_0] : memref<16x128xbf16, #tpu.memory_space<vmem>>, vector<16x128xbf16>
    %c0_1 = arith.constant 0 : index
    %c0_2 = arith.constant 0 : index
    %1 = vector.load %arg2[%c0_1, %c0_2] : memref<128x128xbf16, #tpu.memory_space<vmem>>, vector<128x128xbf16>
    %cst = arith.constant dense<0.000000e+00> : vector<16x128xf32>
    %2 = tpu.matmul %0, %1, %cst {dimension_numbers = #tpu.dot_dimension_numbers<[1], [0], [0], [1], [0, 0, 1, 1], [], []>} : vector<16x128xbf16>, vector<128x128xbf16>, vector<16x128xf32> -> vector<16x128xf32>
    %c0_3 = arith.constant 0 : index
    %c0_4 = arith.constant 0 : index
    %3 = vector.load %arg3[%c0_3, %c0_4] : memref<1x128xf32, #tpu.memory_space<vmem>>, vector<1x128xf32>
    %4 = vector.broadcast %3 : vector<1x128xf32> to vector<16x128xf32>
    %5 = arith.addf %2, %4 : vector<16x128xf32>
    %6 = arith.truncf %5 : vector<16x128xf32> to vector<16x128xbf16>
    %c0_5 = arith.constant 0 : index
    %c0_6 = arith.constant 0 : index
    %7 = vector.load %arg4[%c0_5, %c0_6] : memref<128x128xbf16, #tpu.memory_space<vmem>>, vector<128x128xbf16>
    %cst_7 = arith.constant dense<0.000000e+00> : vector<16x128xf32>
    %8 = tpu.matmul %6, %7, %cst_7 {dimension_numbers = #tpu.dot_dimension_numbers<[1], [0], [0], [1], [0, 0, 1, 1], [], []>} : vector<16x128xbf16>, vector<128x128xbf16>, vector<16x128xf32> -> vector<16x128xf32>
    %c0_8 = arith.constant 0 : index
    %c0_9 = arith.constant 0 : index
    %9 = vector.load %arg5[%c0_8, %c0_9] : memref<1x128xf32, #tpu.memory_space<vmem>>, vector<1x128xf32>
    %10 = vector.broadcast %9 : vector<1x128xf32> to vector<16x128xf32>
    %11 = arith.addf %8, %10 : vector<16x128xf32>
    %12 = arith.negf %11 : vector<16x128xf32>
    %13 = math.exp %12 : vector<16x128xf32>
    %cst_10 = arith.constant 1.000000e+00 : f32
    %14 = vector.broadcast %cst_10 : f32 to vector<16x128xf32>
    %15 = arith.addf %14, %13 : vector<16x128xf32>
    %16 = arith.divf %14, %15 : vector<16x128xf32>
    %17 = arith.mulf %5, %16 : vector<16x128xf32>
    %c0_11 = arith.constant 0 : index
    %c0_12 = arith.constant 0 : index
    %18 = vector.load %arg6[%c0_11, %c0_12] : memref<16x128xf32, #tpu.memory_space<vmem>>, vector<16x128xf32>
    tpu.vector_store %arg6[%c0_11, %c0_12], %17 {strides = array<i32>} : memref<16x128xf32, #tpu.memory_space<vmem>>, vector<16x128xf32>,
    return
  }
  func.func @transform_0(%arg0: i32) -> (i32, i32) {
    %c0_i32 = arith.constant 0 : i32
    %c0_i32_0 = arith.constant 0 : i32
    return %arg0, %c0_i32 : i32, i32
  }
  func.func @transform_1(%arg0: i32) -> (i32, i32) {
    %c0_i32 = arith.constant 0 : i32
    %c0_i32_0 = arith.constant 0 : i32
    %c0_i32_1 = arith.constant 0 : i32
    return %c0_i32, %c0_i32_0 : i32, i32
  }
  func.func @transform_2(%arg0: i32) -> (i32, i32) {
    %c0_i32 = arith.constant 0 : i32
    %c0_i32_0 = arith.constant 0 : i32
    %c0_i32_1 = arith.constant 0 : i32
    return %c0_i32, %c0_i32_0 : i32, i32
  }
  func.func @transform_3(%arg0: i32) -> (i32, i32) {
    %c0_i32 = arith.constant 0 : i32
    %c0_i32_0 = arith.constant 0 : i32
    %c0_i32_1 = arith.constant 0 : i32
    return %c0_i32, %c0_i32_0 : i32, i32
  }
  func.func @transform_4(%arg0: i32) -> (i32, i32) {
    %c0_i32 = arith.constant 0 : i32
    %c0_i32_0 = arith.constant 0 : i32
    %c0_i32_1 = arith.constant 0 : i32
    return %c0_i32, %c0_i32_0 : i32, i32
  }
  func.func @transform_5(%arg0: i32) -> (i32, i32) {
    %c0_i32 = arith.constant 0 : i32
    %c0_i32_0 = arith.constant 0 : i32
    return %arg0, %c0_i32 : i32, i32
  }
}

</mosaic_0001>

<bundles_post_ra>
// kernel: tpu_custom_call.1
= control target key start
LH: loop header
LB: loop body
LE: loop exit
PB: predicated region body
PF: predicated region fallthrough
CT: control target
= control target key end

     0   :  { %10 = vsyncpa [#allocation3], 0  ;;  %s1278_s0 = inlined_call_operand.hbm [shape: bf16[32,128], index: 0, kind: input, shape index: {}]   ;;  %s1279_s1 = inlined_call_operand.hbm [shape: bf16[128,128], index: 1, kind: input, shape index: {}]   ;;  %s1280_s2 = inlined_call_operand.vmem [shape: f32[1,128], index: 2, kind: input, shape index: {}]   ;;  %s1281_s3 = inlined_call_operand.hbm [shape: bf16[128,128], index: 3, kind: input, shape index: {}]   ;;  %s1282_s4 = inlined_call_operand.vmem [shape: f32[1,128], index: 4, kind: input, shape index: {}]   ;;  %s1283_s5 = inlined_call_operand.hbm [shape: f32[32,128], index: 5, kind: output, shape index: {}]  }
   0x1   :  { %12 = vsyncpa [#allocation3 + $0x1], 0 }
   0x2   :  { %13 = vsyncpa [#allocation6], 0 }
   0x3   :  { %14 = vsyncpa [#allocation4], 0 }
   0x4   :  { %16 = vsyncpa [#allocation4 + $0x1], 0  ;;  %s1025_s18 = smov 0   ;;  %s1027_s19 = smov 0  }
   0x5   :  { %s1029_s20 = smov 0   ;;  %s1031_s21 = smov 0  }
   0x6 LB: > { %s1046_s22 = sadd.s32 4294967295, %s983_s21   ;;  %s630_s23 = sadd.s32 4294967294, %s983_s21   ;;  %s983_s21 = sphi %s1031_s21, %s1303_s21   ;;  %s979_s20 = sphi %s1029_s20, %s1302_s20   ;;  %s975_s19 = sphi %s1027_s19, %s1301_s19   ;;  %s971_s18 = sphi %s1025_s18, %s1300_s18  }
   0x7   : > { %p42_p0 = scmp.ne.s32.totalorder %s975_s19, %s971_s18  ;;  %p1284_p1 = scmp.eq.s32.totalorder %s1046_s22, 0 }
   0x8   : > { %p156_p3 = scmp.eq.s32.totalorder %s630_s23, 1  ;;  %p631_p5 = scmp.ge.s32.totalorder %s983_s21, 1 }
   0x9   : > { %p1055_p4 = por %p1284_p1, %p42_p0  ;;  %p163_p7 = scmp.lt.s32.totalorder %s983_s21, 3 }
   0xa   : > { %p1060_p6 = por %p156_p3, %p42_p0  ;;  %s985_s27 = smov [#allocation5]  }
   0xb   : > { %s1287_s24 = scalar_select %p1055_p4, 1, 0 }
   0xc   : > { %s1288_s25 = scalar_select %p1060_p6, 1, 0 }
   0xd   : > { %p1065_p8 = pnand %p631_p5, %p163_p7  ;;  %s175_s28 = sshll.u32 %s985_s27, 4  ;;  %s1069_s28 = int_to_ptr.vmem [resolvable:$true] %s175_s28 }
   0xe   : > { %s986_s30 = smov [#allocation7]   ;;  %s827_s9 = scalar_lea.hbm %s1279_s1, 1024 }
   0xf   : > { %p741_p9 = pneg %p1065_p8  ;;  %s191_s6 = sshll.u32 %s986_s30, 4  ;;  %s1080_s6 = int_to_ptr.vmem [resolvable:$true] %s191_s6 }
  0x10   : > { %p828_p12 = scmp.ne.s32.totalorder %s1279_s1, %s827_s9  ;;  %p834_p5 = scmp.lt.u32.totalorder %s827_s9, %s1279_s1 }
  0x11   : > { %p1076_p11 = pnand %p741_p9, %p1284_p1 }
  0x13   : > { %p829_p13 = pneg %p1076_p11 }
  0x15   : > { %p830_p0 = pnand %p829_p13, %p828_p12 }
  0x17   : > { %p831_p3 = pneg %p830_p0 }
  0x19   : > { %p836_p7 = pnand %p834_p5, %p831_p3 }
  0x1b   : > { %839 = shalt.err (!%p836_p7)
}
  0x1c   : > { %s840_s14 = scalar_lea.vmem %s1069_s28, 1024  ;;  %p848_p2 = scmp.lt.s32.totalorder %s1069_s28, %s1069_s28 }
  0x1d   : > { %p841_p9 = scmp.ne.s32.totalorder %s1069_s28, %s840_s14  ;;  %p849_p12 = scmp.lt.s32.totalorder %s840_s14, %s840_s14 }
  0x1f   : > { %p843_p10 = pnand %p841_p9, %p829_p13  ;;  %p850_p0 = por %p849_p12, %p848_p2 }
  0x21   : > { %p844_p1 = pneg %p843_p10 }
  0x23   : > { %p851_p6 = pnand %p850_p0, %p844_p1 }
  0x25   : > { %854 = shalt.err (!%p851_p6)
}
  0x26   : > { %s987_s15 = smov 64   ;;  %s988_s16 = smov 4  }
  0x27   : > { %744 = dma.hbm_to_vmem [thread:$0]  (!%p1076_p11), %s1279_s1, 1024, %s1069_s28, [#allocation6], %s987_s15, %s987_s15, %s988_s16  }
  0x28   : > { %s855_s7 = scalar_lea.hbm %s1281_s3, 1024 }
  0x29   : > { %p856_p1 = scmp.ne.s32.totalorder %s1281_s3, %s855_s7  ;;  %p862_p10 = scmp.lt.u32.totalorder %s855_s7, %s1281_s3 }
  0x2b   : > { %p858_p2 = pnand %p856_p1, %p829_p13 }
  0x2d   : > { %p859_p6 = pneg %p858_p2 }
  0x2f   : > { %p864_p3 = pnand %p862_p10, %p859_p6 }
  0x31   : > { %867 = shalt.err (!%p864_p3)
}
  0x32   : > { %s868_s28 = scalar_lea.vmem %s1080_s6, 1024  ;;  %p876_p12 = scmp.lt.s32.totalorder %s1080_s6, %s1080_s6 }
  0x33   : > { %p869_p5 = scmp.ne.s32.totalorder %s1080_s6, %s868_s28  ;;  %p877_p0 = scmp.lt.s32.totalorder %s868_s28, %s868_s28 }
  0x35   : > { %p871_p7 = pnand %p869_p5, %p829_p13  ;;  %p878_p1 = por %p877_p0, %p876_p12 }
  0x37   : > { %p872_p9 = pneg %p871_p7 }
  0x39   : > { %p879_p2 = pnand %p878_p1, %p872_p9 }
  0x3b   : > { %882 = shalt.err (!%p879_p2)
}
  0x3c   : > { %747 = dma.hbm_to_vmem [thread:$0]  (!%p1076_p11), %s1281_s3, 1024, %s1080_s6, [#allocation6], %s987_s15, %s987_s15, %s988_s16  }
  0x3d   : > { %s1141_s29 = sadd.s32 1, %s983_s21   ;;  %s29_s14 = sadd.s32 1, %s979_s20 }
  0x3e   : > { %s26_s17 = ssub.s32 %s983_s21, %s1141_s29  ;;  %p36_p13 = scmp.ne.s32.totalorder %s979_s20, %s975_s19 }
  0x3f   : > { %p27_p6 = scmp.eq.s32.totalorder %s26_s17, 0  ;;  %p37_p10 = scmp.eq.s32.totalorder %s983_s21, 0 }
  0x40   : > { %p1291_p3 = scmp.eq.s32.totalorder %s1046_s22, 1  ;;  %p758_p7 = scmp.lt.s32.totalorder %s983_s21, 2 }
  0x41   : > { %s1157_s27 = scalar_select %p27_p6, %s979_s20, %s29_s14  }
  0x42   : > { %p1151_p5 = por %p1291_p3, %p36_p13  ;;  %p38_p9 = por %p37_p10, %p36_p13 }
  0x43   : > { %s208_s30 = sand.u32 1, %s979_s20   ;;  %s669_s6 = sshll.u32 %s983_s21, 7 }
  0x44   : > { %s1292_s23 = scalar_select %p1151_p5, 1, 0 }
  0x45   : > { %s635_s7 = sshll.u32 %s208_s30, 3  ;;  %s1164_s10 = scalar_lea.hbm %s1278_s0, %s669_s6 }
  0x46   : > { %s212_s11 = scalar_lea.vmem [#allocation2], %s635_s7  ;;  %p1168_p11 = pnand %p758_p7, %p38_p9 }
  0x47   : > { %s219_s28 = sshll.u32 %s212_s11, 4  ;;  %s1172_s13 = scalar_lea.sflag [#allocation3], %s208_s30  ;;  %s1166_s28 = int_to_ptr.vmem [resolvable:$true] %s219_s28 }
  0x48   : > { %s883_s14 = scalar_lea.hbm %s1164_s10, 128  ;;  %p885_p0 = pneg %p1168_p11 }
  0x49   : > { %p884_p12 = scmp.ne.s32.totalorder %s1164_s10, %s883_s14  ;;  %s888_s6 = scalar_lea.hbm %s1278_s0, 256 }
  0x4a   : > { %p889_p13 = scmp.lt.u32.totalorder %s1164_s10, %s1278_s0  ;;  %p890_p6 = scmp.lt.u32.totalorder %s888_s6, %s883_s14 }
  0x4b   : > { %p886_p1 = pnand %p885_p0, %p884_p12  ;;  %p892_p3 = scmp.lt.u32.totalorder %s883_s14, %s1164_s10 }
  0x4c   : > { %p891_p10 = por %p890_p6, %p889_p13 }
  0x4d   : > { %p887_p2 = pneg %p886_p1 }
  0x4e   : > { %p893_p7 = por %p892_p3, %p891_p10 }
  0x50   : > { %p894_p9 = pnand %p893_p7, %p887_p2 }
  0x52   : > { %897 = shalt.err (!%p894_p9)
}
  0x53   : > { %s898_s30 = scalar_lea.vmem %s1166_s28, 128  ;;  %s989_s11 = smov [#allocation2]  }
  0x54   : > { %p899_p12 = scmp.ne.s32.totalorder %s1166_s28, %s898_s30  ;;  %s903_s17 = sshll.u32 %s989_s11, 4  ;;  %s904_s17 = int_to_ptr.vmem [resolvable:$false] %s903_s17 }
  0x55   : > { %s905_s7 = scalar_lea.vmem %s904_s17, 256  ;;  %p906_p4 = scmp.lt.s32.totalorder %s1166_s28, %s904_s17 }
  0x56   : > { %p901_p1 = pnand %p899_p12, %p885_p0  ;;  %p907_p13 = scmp.lt.s32.totalorder %s905_s7, %s898_s30 }
  0x58   : > { %p902_p5 = pneg %p901_p1  ;;  %p908_p6 = por %p907_p13, %p906_p4 }
  0x5a   : > { %p909_p10 = pnand %p908_p6, %p902_p5 }
  0x5c   : > { %912 = shalt.err (!%p909_p10)
}
  0x5d   : > { %751 = dma.hbm_to_vmem [thread:$0]  (!%p1168_p11), %s1164_s10, 128, %s1166_s28, %s1172_s13, %s987_s15, %s987_s15, %s988_s16  }
  0x5e   : > { %231 = sbr.rel (%p1065_p8) target bundleno = 616 (0x268), region = 40  ;;  %s1206_s14 = sand.u32 (!%p1065_p8), 1, %s975_s19  }
  0x5f   : > { %s639_s6 = sshll.u32 (!%p1065_p8), %s1206_s14, 3  ;;  %s234_s8 = scalar_lea.sflag (!%p1065_p8), [#allocation3], %s1206_s14 }
  0x60   : > { %s1210_s9 = scalar_lea.vmem (!%p1065_p8), [#allocation2], %s639_s6  ;;  %p1294_p4 = scmp.ne.s32.totalorder (!%p1065_p8), %s1287_s24, 0 }
  0x65   : > { %958 = dma.done.wait (%p1294_p4), %s234_s8, 128  }
  0x66   : > { %960 = vsyncadd (%p1294_p4), %s234_s8, 4294967168  ;;  %p1295_p5 = scmp.eq.s32.totalorder %s1046_s22, 0 }
  0x68   : > { %962 = dma.done.wait (%p1295_p5), [#allocation6], 2048   ;;  %p1296_p8 = pmov %p1295_p5 }
  0x69   : > { %v990_v0 = vmov 0.0   ;;  %vm991_vm0 = vmmov 0   ;;  %v802_v1 = vld [vmem:[#allocation5] sm:$0xff]   ;;  %v803_v2 = vld [vmem:[#allocation5 + $0x8] sm:$0xff]   ;;  %v804_v3 = vld [vmem:[#allocation5 + $0x10] sm:$0xff]   ;;  %s642_s10 = sshll.u32 %s1206_s14, 4 }
  0x6a   : > { %964 = vsyncadd (%p1296_p8), [#allocation6], 4294965248  ;;  %689 = vmatprep.subr.bf16.mxu0 %v990_v0  ;;  %705 = vmatprep.mubr.msk.bf16.mxu0 %vm991_vm0, %v990_v0  ;;  %v811_v4 = vld [vmem:[#allocation7] sm:$0xff]   ;;  %v805_v5 = vld [vmem:[#allocation5 + $0x18] sm:$0xff]   ;;  %s670_s28 = sshll.u32 %s1046_s22, 8  ;;  %s271_s12 = scalar_lea.vmem [#allocation8], %s642_s10 }
  0x6b   : > { %709 = vmatprep.subr.bf16.mxu1 %v990_v0  ;;  %725 = vmatprep.mubr.msk.bf16.mxu1 %vm991_vm0, %v990_v0  ;;  %v812_v6 = vld [vmem:[#allocation7 + $0x8] sm:$0xff]   ;;  %v806_v7 = vld [vmem:[#allocation5 + $0x20] sm:$0xff]   ;;  %v813_v8 = vld [vmem:[#allocation7 + $0x10] sm:$0xff]   ;;  %s538_s13 = sshll.u32 %s271_s12, 4  ;;  %s1232_s17 = scalar_lea.hbm %s1283_s5, %s670_s28  ;;  %s1234_s13 = int_to_ptr.vmem [resolvable:$true] %s538_s13 }
  0x6c   : > { %690 = vmatpush3.bf16.msra.mxu0 %v802_v1  ;;  %710 = vmatpush3.bf16.msra.mxu1 %v811_v4  ;;  %v807_v9 = vld [vmem:[#allocation5 + $0x28] sm:$0xff]   ;;  %v814_v10 = vld [vmem:[#allocation7 + $0x18] sm:$0xff]   ;;  %v808_v11 = vld [vmem:[#allocation5 + $0x30] sm:$0xff]   ;;  %s525_s7 = scalar_lea.sflag [#allocation4], %s1206_s14  ;;  %s913_s22 = scalar_lea.vmem %s1234_s13, 256 }
  0x6d   : > { %691 = vmatprep.subr.bf16.mxu0 %v990_v0  ;;  %711 = vmatprep.subr.bf16.mxu1 %v990_v0  ;;  %v815_v12 = vld [vmem:[#allocation7 + $0x20] sm:$0xff]   ;;  %v809_v13 = vld [vmem:[#allocation5 + $0x38] sm:$0xff]   ;;  %v816_v14 = vld [vmem:[#allocation7 + $0x28] sm:$0xff]   ;;  %p914_p11 = scmp.ne.s32.totalorder %s1234_s13, %s913_s22  ;;  %p1297_p0 = scmp.ne.s32.totalorder %s1292_s23, 0 }
  0x6e   : > { %v810_v15 = vld [vmem:[%s1210_s9] sm:$0xff]   ;;  %s992_s6 = smov [#allocation8]  }
  0x6f   : > { %v817_v16 = vld [vmem:[#allocation7 + $0x30] sm:$0xff]   ;;  %v818_v17 = vld [vmem:[#allocation7 + $0x38] sm:$0xff]   ;;  %p915_p2 = pnand %p914_p11, %p1297_p0  ;;  %s917_s8 = sshll.u32 %s992_s6, 4  ;;  %s918_s8 = int_to_ptr.vmem [resolvable:$false] %s917_s8 }
  0x70   : > { %692 = vmatpush3.bf16.msra.mxu0 %v803_v2  ;;  %712 = vmatpush3.bf16.msra.mxu1 %v812_v6  ;;  %v643_v18 = vld [vmem:[%s1280_s2] ss:$0 sm:$0xff]  ;;  %s919_s9 = scalar_lea.vmem %s918_s8, 512  ;;  %p920_p7 = scmp.lt.s32.totalorder %s1234_s13, %s918_s8 }
  0x71   : > { %693 = vmatprep.subr.bf16.mxu0 %v990_v0  ;;  %713 = vmatprep.subr.bf16.mxu1 %v990_v0  ;;  %v653_v26 = vld [vmem:[%s1282_s4] ss:$0 sm:$0xff]  ;;  %p916_p3 = pneg %p915_p2  ;;  %p921_p9 = scmp.lt.s32.totalorder %s919_s9, %s913_s22 }
  0x73   : > { %p922_p12 = por %p921_p9, %p920_p7 }
  0x74   : > { %694 = vmatpush3.bf16.msra.mxu0 %v804_v3  ;;  %714 = vmatpush3.bf16.msra.mxu1 %v813_v8 }
  0x75   : > { %695 = vmatprep.subr.bf16.mxu0 %v990_v0  ;;  %715 = vmatprep.subr.bf16.mxu1 %v990_v0  ;;  %p923_p1 = pnand %p922_p12, %p916_p3 }
  0x78   : > { %696 = vmatpush3.bf16.msra.mxu0 %v805_v5  ;;  %716 = vmatpush3.bf16.msra.mxu1 %v814_v10 }
  0x79   : > { %697 = vmatprep.subr.bf16.mxu0 %v990_v0  ;;  %717 = vmatprep.subr.bf16.mxu1 %v990_v0 }
  0x7c   : > { %698 = vmatpush3.bf16.msra.mxu0 %v806_v7  ;;  %718 = vmatpush3.bf16.msra.mxu1 %v815_v12 }
  0x7d   : > { %699 = vmatprep.subr.bf16.mxu0 %v990_v0  ;;  %719 = vmatprep.subr.bf16.mxu1 %v990_v0 }
  0x80   : > { %700 = vmatpush3.bf16.msra.mxu0 %v807_v9  ;;  %720 = vmatpush3.bf16.msra.mxu1 %v816_v14 }
  0x81   : > { %701 = vmatprep.subr.bf16.mxu0 %v990_v0  ;;  %721 = vmatprep.subr.bf16.mxu1 %v990_v0 }
  0x84   : > { %702 = vmatpush3.bf16.msra.mxu0 %v808_v11  ;;  %722 = vmatpush3.bf16.msra.mxu1 %v817_v16 }
  0x85   : > { %703 = vmatprep.subr.bf16.mxu0 %v990_v0  ;;  %723 = vmatprep.subr.bf16.mxu1 %v990_v0 }
  0x88   : > { %704 = vmatpush3.bf16.msra.mxu0 %v809_v13  ;;  %724 = vmatpush3.bf16.msra.mxu1 %v818_v17 }
  0x8b   : > { %706 = vmatmul.mubr.bf16.vlgmr.msra.gmra.mrb[0].mxu0 %v810_v15 }
 0x15e   : > { %v388_v19 = vpop.f32.mrb[0].mxu0 }
 0x15f   : > { %v707_v20 = vpop.f32.mrb[1].mxu0  ;;  %v389_v22 = vadd.f32 %v643_v18, %v388_v19 }
 0x160   : > { %v391_v21 = vpop.f32.mrb[2].mxu0 }
 0x161   : > { %v392_v23 = vadd.f32 %v643_v18, %v391_v21  ;;  %v708_v24 = vpop.f32.mrb[3].mxu0 }
 0x163   : > { %v395_v25 = vpack.c.bf16 %v392_v23, %v389_v22 }
 0x165   : > { %726 = vmatmul.mubr.bf16.vlgmr.msra.gmra.mrb[0].mxu1 %v395_v25 }
 0x238   : > { %v501_v27 = vpop.f32.mrb[0].mxu1 }
 0x239   : > { %v502_v28 = vadd.f32 %v653_v26, %v501_v27  ;;  %v727_v29 = vpop.f32.mrb[1].mxu1 }
 0x23a   : > { %v504_v30 = vpop.f32.mrb[2].mxu1 }
 0x23b   : > { %v662_v31 = vmul.f32 -1.442695, %v502_v28  ;;  %v505_v32 = vadd.f32 %v653_v26, %v504_v30  ;;  %v728_v33 = vpop.f32.mrb[3].mxu1 }
 0x23d   : > { %819 = vpow2.f32 %v662_v31  ;;  %v663_v34 = vmul.f32 -1.442695, %v505_v32 }
 0x23f   : > { %821 = vpow2.f32 %v663_v34 }
 0x247   : > { %v820_v35 = vpop.eup %819 }
 0x248   : > { %v514_v36 = vadd.f32 1.0, %v820_v35 }
 0x249   : > { %v822_v37 = vpop.eup %821 }
 0x24a   : > { %823 = vrcp.f32 %v514_v36  ;;  %v515_v38 = vadd.f32 1.0, %v822_v37 }
 0x24c   : > { %825 = vrcp.f32 %v515_v38 }
 0x254   : > { %v824_v39 = vpop.eup %823 }
 0x255   : > { %v520_v40 = vmul.f32 %v824_v39, %v389_v22 }
 0x256   : > { %v826_v41 = vpop.eup %825 }
 0x257   : > { %v521_v42 = vmul.f32 %v826_v41, %v392_v23  ;;  %522 = vst [vmem:[%s271_s12] sm:$0xff] %v520_v40 }
 0x259   : > { %523 = vst [vmem:[%s271_s12 + $0x8] sm:$0xff] %v521_v42 }
 0x25a   : > { %926 = shalt.err (!%p923_p1)
}
 0x25b   : > { %s927_s24 = scalar_lea.hbm %s1232_s17, 256  ;;  %s931_s16 = scalar_lea.hbm %s1283_s5, 512 }
 0x25c   : > { %p928_p13 = scmp.ne.s32.totalorder %s1232_s17, %s927_s24  ;;  %p932_p4 = scmp.lt.u32.totalorder %s1232_s17, %s1283_s5 }
 0x25d   : > { %p933_p5 = scmp.lt.u32.totalorder %s931_s16, %s927_s24  ;;  %p935_p11 = scmp.lt.u32.totalorder %s927_s24, %s1232_s17 }
 0x25e   : > { %p929_p6 = pnand %p928_p13, %p1297_p0 }
 0x25f   : > { %p934_p8 = por %p933_p5, %p932_p4 }
 0x260   : > { %p930_p10 = pneg %p929_p6 }
 0x261   : > { %p936_p2 = por %p935_p11, %p934_p8 }
 0x263   : > { %p937_p3 = pnand %p936_p2, %p930_p10 }
 0x265   : > { %940 = shalt.err (!%p937_p3)
}
 0x266   : > { %s993_s12 = smov 128   ;;  %s994_s30 = smov 8  }
 0x267   : > { %739 = dma.vmem_to_hbm [thread:$0]  (%p1297_p0), %s1234_s13, 256, %s1232_s17, %s525_s7, %s993_s12, %s993_s12, %s994_s30  }
 0x268 PF: > { %s553_s11 = sand.u32 1, %s971_s18   ;;  %p1298_p7 = scmp.ne.s32.totalorder %s1288_s25, 0 }
 0x269   : > { %p1299_p9 = scmp.ge.s32.totalorder %s983_s21, 2  ;;  %s554_s22 = scalar_lea.sflag [#allocation4], %s553_s11 }
 0x26b   : > { %p753_p12 = pnand %p1299_p9, %p1298_p7 }
 0x26d   : > { %966 = dma.done.wait (!%p753_p12), %s554_s22, 256  }
 0x26e   : > { %968 = vsyncadd (!%p753_p12), %s554_s22, 4294967040  ;;  %p19_p1 = scmp.ge.s32.totalorder %s1141_s29, 4   ;;  %s1300_s18 = smov %s975_s19 }
 0x26f   : > { %s1301_s19 = smov %s979_s20  ;;  %s1302_s20 = smov %s1157_s27 }
 0x270   : > { %s1303_s21 = smov %s1141_s29  ;;  %21 = sbr.rel (!%p19_p1) target bundleno = 6 (0x6), region = 93 }
 0x277   :  { %559 = vsyncpa [#allocation3], 1 }
 0x278   :  { %561 = vsyncpa [#allocation3 + $0x1], 1 }
 0x279   :  { %562 = vsyncpa [#allocation6], 1 }
 0x27a   :  { %563 = vsyncpa [#allocation4], 1 }
 0x27b   :  { %565 = vsyncpa [#allocation4 + $0x1], 1 }

</bundles_post_ra>
